<compile_context>
chip_gen: v6e
topology: v6e:2x2x1
jax: 0.10.0
libtpu: 0.0.40
codegen_flags: <defaults>
</compile_context>

<pallas_src>
import functools

import jax
import jax.numpy as jnp
from jax import lax
from jax.experimental import pallas as pl
from jax.experimental.pallas import tpu as pltpu


def _pick_block_b(batch, seq):
    """Batch elements folded per grid step (rows per tile = block_b * seq)."""
    max_rows = 2048  # keeps double-buffered f32 activation tiles far below VMEM limits (v7x: 64 MiB)
    if batch * seq <= max_rows:
        return batch  # full fold -> grid of 1 (one big MXU matmul)
    # Otherwise split into >=2 parallel tiles (v7x has 2 TensorCores) whose row count is a
    # multiple of 128 (MXU-friendly and satisfies the lane-dense out-block constraint).
    for cand in range(batch // 2, 0, -1):
        rows = cand * seq
        if batch % cand == 0 and rows % 128 == 0 and rows <= max_rows:
            return cand
    return batch


def self_attention_kernel(x_ref, w1_ref, b1_ref, w2_ref, b2_ref, out_ref, *, block_b, seq):
    # x_ref:  (block_b*seq, laten_dim)   batch-folded activations
    # w1_ref: (node, laten_dim)          b1_ref: (1, node)
    # w2_ref: (num_head, node)           b2_ref: (1, num_head)
    # out_ref: (num_head, block_b*seq)   head-major, lane-dense
    rows = block_b * seq

    # W1 + ReLU: x @ w1^T expressed via contracting dims -> no operand transpose in-kernel.
    h = lax.dot_general(x_ref[...], w1_ref[...], (((1,), (1,)), ((), ())),
                        preferred_element_type=jnp.float32)
    h = jnp.maximum(h + b1_ref[...], 0.0)                         # (rows, node)

    # W2: h @ w2^T, again via contracting dims.
    logits = lax.dot_general(h, w2_ref[...], (((1,), (1,)), ((), ())),
                             preferred_element_type=jnp.float32)
    logits = logits + b2_ref[...]                                  # (rows, num_head)
    num_head = logits.shape[1]

    # Softmax over the sequence axis, independently per (batch element, head).
    # Leading-dim reshape only (seq is a multiple of 8, lane dim untouched) -> layout-free.
    l3 = logits.reshape(block_b, seq, num_head)
    m = jnp.max(l3, axis=1, keepdims=True)
    e = jnp.exp(l3 - m)
    d = jnp.sum(e, axis=1, keepdims=True)
    p = e * pl.reciprocal(d, approx=True)                          # EUP reciprocal (free slot)

    # Single small XLU transpose of the final probabilities so the store is lane-dense
    # (num_head last-dim stores would be 4-of-128-lane masked vst); the (B, seq, num_head)
    # relayout is done in the XLA wrapper.
    out_ref[...] = p.reshape(rows, num_head).T


def self_attention(data, w1, b1, w2, b2, *, block_b=None):
    """data: (B, laten_dim, seq) f32 -> (B, seq, num_head) f32, matching the PyTorch module."""
    B, laten_dim, seq = data.shape
    node = w1.shape[0]
    num_head = w2.shape[0]

    if block_b is None:
        block_b = _pick_block_b(B, seq)
    assert B % block_b == 0
    n_tiles = B // block_b
    rows = block_b * seq

    # Layout plumbing in the cheap XLA wrapper: fold batch into the matmul M dimension.
    x2d = jnp.swapaxes(data, 1, 2).reshape(B * seq, laten_dim)     # == data.transpose(1, 2)
    b1_2d = b1.reshape(1, node)
    b2_2d = b2.reshape(1, num_head)

    kernel = functools.partial(self_attention_kernel, block_b=block_b, seq=seq)

    out_hm = pl.pallas_call(
        kernel,
        out_shape=jax.ShapeDtypeStruct((num_head, B * seq), jnp.float32),
        grid_spec=pltpu.PrefetchScalarGridSpec(
            num_scalar_prefetch=0,
            grid=(n_tiles,),
            in_specs=[
                pl.BlockSpec((rows, laten_dim), lambda i: (i, 0)),
                # Weights/biases: constant index_map -> fetched once and reused across tiles.
                pl.BlockSpec((node, laten_dim), lambda i: (0, 0)),
                pl.BlockSpec((1, node), lambda i: (0, 0)),
                pl.BlockSpec((num_head, node), lambda i: (0, 0)),
                pl.BlockSpec((1, num_head), lambda i: (0, 0)),
            ],
            out_specs=pl.BlockSpec((num_head, rows), lambda i: (0, i)),
        ),
        compiler_params=pltpu.CompilerParams(
            dimension_semantics=("parallel",)),
    )(x2d, w1, b1_2d, w2, b2_2d)

    # Head-major (num_head, B*seq) -> (B, seq, num_head) expected by the module.
    return jnp.transpose(out_hm.reshape(num_head, B, seq), (1, 2, 0))


def self_attention_ref(data, w1, b1, w2, b2):
    """Pure-JAX reference matching the PyTorch forward."""
    xt = jnp.swapaxes(data, 1, 2)                                   # (B, seq, laten_dim)
    h = jnp.maximum(jnp.einsum("bsd,nd->bsn", xt, w1) + b1, 0.0)
    logits = jnp.einsum("bsn,hn->bsh", h, w2) + b2
    return jax.nn.softmax(logits, axis=1)


if __name__ == "__main__":
    # Small shapes consistent with the module.
    B, laten_dim, seq = 2, 32, 16
    node, num_head = 64, 4

    key = jax.random.PRNGKey(0)
    k_data, k_w1, k_b1, k_w2, k_b2 = jax.random.split(key, 5)

    data = jax.random.normal(k_data, (B, laten_dim, seq), dtype=jnp.float32)

    # Deterministic parameter init (PyTorch-style uniform bounds).
    lim1 = 1.0 / (laten_dim ** 0.5)
    lim2 = 1.0 / (node ** 0.5)
    w1 = jax.random.uniform(k_w1, (node, laten_dim), jnp.float32, -lim1, lim1)
    b1 = jax.random.uniform(k_b1, (node,), jnp.float32, -lim1, lim1)
    w2 = jax.random.uniform(k_w2, (num_head, node), jnp.float32, -lim2, lim2)
    b2 = jax.random.uniform(k_b2, (num_head,), jnp.float32, -lim2, lim2)

    out = self_attention(data, w1, b1, w2, b2)
    out = jax.block_until_ready(out)

    ref = self_attention_ref(data, w1, b1, w2, b2)
    assert out.shape == (B, seq, num_head)
    # approx=True (EUP) reciprocal in the softmax -> slightly relaxed comparison tolerance.
    assert jnp.allclose(out, ref, atol=1e-3, rtol=1e-3), float(jnp.max(jnp.abs(out - ref)))

    print("KERNEL_OK")
</pallas_src>

<mosaic_0001>
module attributes {stable_mosaic.version = 11 : i64} {
  func.func @self_attention_kernel(%arg0: i32, %arg1: memref<32x32xf32, #tpu.memory_space<vmem>>, %arg2: memref<64x32xf32, #tpu.memory_space<vmem>>, %arg3: memref<1x64xf32, #tpu.memory_space<vmem>>, %arg4: memref<4x64xf32, #tpu.memory_space<vmem>>, %arg5: memref<1x4xf32, #tpu.memory_space<vmem>>, %arg6: memref<4x32xf32, #tpu.memory_space<vmem>>) attributes {dimension_semantics = [#tpu.dimension_semantics<parallel>], iteration_bounds = array<i64: 1>, scalar_prefetch = 0 : i64, scratch_operands = 0 : i64, tpu.core_type = #tpu.core_type<tc>, window_params = [{transform_indices = @transform_0, window_bounds = array<i64: 32, 32>}, {pipeline_mode = #tpu.pipeline_mode<synchronous>, transform_indices = @transform_1, window_bounds = array<i64: 64, 32>}, {pipeline_mode = #tpu.pipeline_mode<synchronous>, transform_indices = @transform_2, window_bounds = array<i64: 1, 64>}, {pipeline_mode = #tpu.pipeline_mode<synchronous>, transform_indices = @transform_3, window_bounds = array<i64: 4, 64>}, {pipeline_mode = #tpu.pipeline_mode<synchronous>, transform_indices = @transform_4, window_bounds = array<i64: 1, 4>}, {transform_indices = @transform_5, window_bounds = array<i64: 4, 32>}]} {
    %c0 = arith.constant 0 : index
    %c0_0 = arith.constant 0 : index
    %0 = vector.load %arg1[%c0, %c0_0] : memref<32x32xf32, #tpu.memory_space<vmem>>, vector<32x32xf32>
    %c0_1 = arith.constant 0 : index
    %c0_2 = arith.constant 0 : index
    %1 = vector.load %arg2[%c0_1, %c0_2] : memref<64x32xf32, #tpu.memory_space<vmem>>, vector<64x32xf32>
    %cst = arith.constant dense<0.000000e+00> : vector<32x64xf32>
    %2 = tpu.matmul %0, %1, %cst {dimension_numbers = #tpu.dot_dimension_numbers<[1], [1], [0], [0], [0, 0, 1, 0], [], []>} : vector<32x32xf32>, vector<64x32xf32>, vector<32x64xf32> -> vector<32x64xf32>
    %c0_3 = arith.constant 0 : index
    %c0_4 = arith.constant 0 : index
    %3 = vector.load %arg3[%c0_3, %c0_4] : memref<1x64xf32, #tpu.memory_space<vmem>>, vector<1x64xf32>
    %4 = vector.broadcast %3 : vector<1x64xf32> to vector<32x64xf32>
    %5 = arith.addf %2, %4 : vector<32x64xf32>
    %cst_5 = arith.constant 0.000000e+00 : f32
    %6 = vector.broadcast %cst_5 : f32 to vector<32x64xf32>
    %7 = arith.maximumf %5, %6 : vector<32x64xf32>
    %c0_6 = arith.constant 0 : index
    %c0_7 = arith.constant 0 : index
    %8 = vector.load %arg4[%c0_6, %c0_7] : memref<4x64xf32, #tpu.memory_space<vmem>>, vector<4x64xf32>
    %cst_8 = arith.constant dense<0.000000e+00> : vector<32x4xf32>
    %9 = tpu.matmul %7, %8, %cst_8 {dimension_numbers = #tpu.dot_dimension_numbers<[1], [1], [0], [0], [0, 0, 1, 0], [], []>} : vector<32x64xf32>, vector<4x64xf32>, vector<32x4xf32> -> vector<32x4xf32>
    %c0_9 = arith.constant 0 : index
    %c0_10 = arith.constant 0 : index
    %10 = vector.load %arg5[%c0_9, %c0_10] : memref<1x4xf32, #tpu.memory_space<vmem>>, vector<1x4xf32>
    %11 = vector.broadcast %10 : vector<1x4xf32> to vector<32x4xf32>
    %12 = arith.addf %9, %11 : vector<32x4xf32>
    %13 = vector.shape_cast %12 : vector<32x4xf32> to vector<2x16x4xf32>
    %cst_11 = arith.constant dense<0xFF800000> : vector<2x4xf32>
    %14 = vector.multi_reduction <maximumf>, %13, %cst_11 [1] : vector<2x16x4xf32> to vector<2x4xf32>
    %15 = vector.shape_cast %14 : vector<2x4xf32> to vector<2x1x4xf32>
    %16 = vector.broadcast %15 : vector<2x1x4xf32> to vector<2x16x4xf32>
    %17 = arith.subf %13, %16 : vector<2x16x4xf32>
    %18 = math.exp %17 : vector<2x16x4xf32>
    %cst_12 = arith.constant dense<0.000000e+00> : vector<2x4xf32>
    %19 = vector.multi_reduction <add>, %18, %cst_12 [1] : vector<2x16x4xf32> to vector<2x4xf32>
    %20 = vector.shape_cast %19 : vector<2x4xf32> to vector<2x1x4xf32>
    %21 = tpu.reciprocal %20 {approx = true} : vector<2x1x4xf32> -> vector<2x1x4xf32>
    %22 = vector.broadcast %21 : vector<2x1x4xf32> to vector<2x16x4xf32>
    %23 = arith.mulf %18, %22 : vector<2x16x4xf32>
    %24 = vector.shape_cast %23 : vector<2x16x4xf32> to vector<32x4xf32>
    %25 = tpu.transpose %24, [1, 0] : vector<32x4xf32> -> vector<4x32xf32>
    %c0_13 = arith.constant 0 : index
    %c0_14 = arith.constant 0 : index
    %26 = vector.load %arg6[%c0_13, %c0_14] : memref<4x32xf32, #tpu.memory_space<vmem>>, vector<4x32xf32>
    tpu.vector_store %arg6[%c0_13, %c0_14], %25 {strides = array<i32>} : memref<4x32xf32, #tpu.memory_space<vmem>>, vector<4x32xf32>,
    return
  }
  func.func @transform_0(%arg0: i32) -> (i32, i32) {
    %c0_i32 = arith.constant 0 : i32
    %c0_i32_0 = arith.constant 0 : i32
    return %arg0, %c0_i32 : i32, i32
  }
  func.func @transform_1(%arg0: i32) -> (i32, i32) {
    %c0_i32 = arith.constant 0 : i32
    %c0_i32_0 = arith.constant 0 : i32
    %c0_i32_1 = arith.constant 0 : i32
    return %c0_i32, %c0_i32_0 : i32, i32
  }
  func.func @transform_2(%arg0: i32) -> (i32, i32) {
    %c0_i32 = arith.constant 0 : i32
    %c0_i32_0 = arith.constant 0 : i32
    %c0_i32_1 = arith.constant 0 : i32
    return %c0_i32, %c0_i32_0 : i32, i32
  }
  func.func @transform_3(%arg0: i32) -> (i32, i32) {
    %c0_i32 = arith.constant 0 : i32
    %c0_i32_0 = arith.constant 0 : i32
    %c0_i32_1 = arith.constant 0 : i32
    return %c0_i32, %c0_i32_0 : i32, i32
  }
  func.func @transform_4(%arg0: i32) -> (i32, i32) {
    %c0_i32 = arith.constant 0 : i32
    %c0_i32_0 = arith.constant 0 : i32
    %c0_i32_1 = arith.constant 0 : i32
    return %c0_i32, %c0_i32_0 : i32, i32
  }
  func.func @transform_5(%arg0: i32) -> (i32, i32) {
    %c0_i32 = arith.constant 0 : i32
    %c0_i32_0 = arith.constant 0 : i32
    return %c0_i32, %arg0 : i32, i32
  }
}

</mosaic_0001>

<bundles_post_ra>
// kernel: tpu_custom_call.1
= control target key start
LH: loop header
LB: loop body
LE: loop exit
PB: predicated region body
PF: predicated region fallthrough
CT: control target
= control target key end

     0   :  { %vm40_vm0 = vcmask 261120   ;;  %s593_s0 = inlined_call_operand.vmem [shape: f32[32,32], index: 0, kind: input, shape index: {}]   ;;  %s594_s1 = inlined_call_operand.vmem [shape: f32[64,32], index: 1, kind: input, shape index: {}]   ;;  %s595_s2 = inlined_call_operand.vmem [shape: f32[1,64], index: 2, kind: input, shape index: {}]   ;;  %s596_s3 = inlined_call_operand.vmem [shape: f32[4,64], index: 3, kind: input, shape index: {}]   ;;  %s597_s4 = inlined_call_operand.vmem [shape: f32[1,4], index: 4, kind: input, shape index: {}]   ;;  %s598_s5 = inlined_call_operand.hbm [shape: f32[4,32], index: 5, kind: output, shape index: {}]  }
   0x1   :  { %v32_v0 = vld [vmem:[%s594_s1 + $0x38] sm:$0xff]  ;;  %v31_v1 = vld [vmem:[%s594_s1 + $0x30] sm:$0xff]  ;;  %v21_v2 = vld [vmem:[%s593_s0] sm:$0xff] }
   0x2   :  { %414 = vmatprep.subr.msk.mxu0 %vm40_vm0, %v32_v0  ;;  %430 = vmatprep.mubr.msk.f32.mxu0 %vm40_vm0, %v21_v2  ;;  %v30_v3 = vld [vmem:[%s594_s1 + $0x28] sm:$0xff] }
   0x3   :  { %415 = vmatpush3.xpose.msk.msra.mxu0 %vm40_vm0, %v32_v0 }
   0x4   :  { %416 = vmatprep.subr.msk.mxu0 %vm40_vm0, %v31_v1 }
   0x5   :  { %10 = vsyncpa [#allocation3], 0  ;;  %v29_v4 = vld [vmem:[%s594_s1 + $0x20] sm:$0xff]  ;;  %v28_v5 = vld [vmem:[%s594_s1 + $0x18] sm:$0xff]  ;;  %vm174_vm1 = vcmask 523264   ;;  %vm275_vm2 = vcmask 31744  }
   0x6   :  { %v27_v6 = vld [vmem:[%s594_s1 + $0x10] sm:$0xff]  ;;  %v26_v7 = vld [vmem:[%s594_s1 + $0x8] sm:$0xff]  ;;  %v25_v8 = vld [vmem:[%s594_s1] sm:$0xff]  ;;  %vm362_vm3 = vcmask 257024  }
   0x7   :  { %417 = vmatpush3.xpose.msk.msra.mxu0 %vm40_vm0, %v31_v1  ;;  %v22_v9 = vld [vmem:[%s593_s0 + $0x8] sm:$0xff]  ;;  %v23_v10 = vld [vmem:[%s593_s0 + $0x10] sm:$0xff]  ;;  %v24_v11 = vld [vmem:[%s593_s0 + $0x18] sm:$0xff] }
   0x8   :  { %418 = vmatprep.subr.msk.mxu0 %vm40_vm0, %v30_v3  ;;  %v166_v12 = vld [vmem:[%s596_s3] sm:$0xf]  ;;  %s480_s3 = smov [#allocation2]  }
   0x9   :  { %436 = vmatprep.subr.msk.mxu1 %vm174_vm1, %v166_v12  ;;  %v378_v13 = vld [vmem:[%s595_s2] ss:$0 sm:$0xff] }
   0xa   :  { %437 = vmatpush3.xpose.msk.msra.mxu1 %vm174_vm1, %v166_v12  ;;  %v391_v26 = vld [vmem:[%s597_s4] ss:$0 sm:$0xff]  ;;  %s370_s4 = sshll.u32 %s480_s3, 4  ;;  %s371_s4 = int_to_ptr.vmem [resolvable:$true] %s370_s4 }
   0xb   :  { %419 = vmatpush3.xpose.msk.msra.mxu0 %vm40_vm0, %v30_v3  ;;  %s458_s20 = scalar_lea.vmem %s371_s4, 64  ;;  %p463_p1 = scmp.lt.s32.totalorder %s371_s4, %s371_s4 }
   0xc   :  { %420 = vmatprep.subr.msk.mxu0 %vm40_vm0, %v29_v4  ;;  %p459_p0 = scmp.ne.s32.totalorder %s371_s4, %s458_s20  ;;  %p464_p2 = scmp.lt.s32.totalorder %s458_s20, %s458_s20 }
   0xe   :  { %p465_p3 = por %p464_p2, %p463_p1 }
   0xf   :  { %421 = vmatpush3.xpose.msk.msra.mxu0 %vm40_vm0, %v29_v4 }
  0x10   :  { %422 = vmatprep.subr.msk.mxu0 %vm40_vm0, %v28_v5  ;;  %p466_p4 = pnand %p465_p3, %p459_p0 }
  0x13   :  { %423 = vmatpush3.xpose.msk.msra.mxu0 %vm40_vm0, %v28_v5 }
  0x14   :  { %424 = vmatprep.subr.msk.mxu0 %vm40_vm0, %v27_v6 }
  0x17   :  { %425 = vmatpush3.xpose.msk.msra.mxu0 %vm40_vm0, %v27_v6 }
  0x18   :  { %426 = vmatprep.subr.msk.mxu0 %vm40_vm0, %v26_v7 }
  0x1b   :  { %427 = vmatpush3.xpose.msk.msra.mxu0 %vm40_vm0, %v26_v7 }
  0x1c   :  { %428 = vmatprep.subr.msk.mxu0 %vm40_vm0, %v25_v8 }
  0x1f   :  { %429 = vmatpush3.xpose.msk.msra.mxu0 %vm40_vm0, %v25_v8 }
  0x22   :  { %431 = vmatmul.mubr.msk.f32.vlgmr.msra.gmra.mxu0 %vm40_vm0, %v22_v9 }
  0x23   :  { %433 = vmatprep.mubr.msk.f32.mxu0 %vm40_vm0, %v23_v10 }
  0x26   :  { %434 = vmatmul.mubr.msk.f32.gmra.mxu0 %vm40_vm0, %v24_v11 }
  0xe2   :  { %v432_v14 = vpop.f32.mrf.mxu0 }
  0xe3   :  { %v149_v15 = vadd.f32 %v432_v14, %v378_v13 }
  0xe4   :  { %v143_v16 = vpop.f32.mrf.mxu0 }
  0xe5   :  { %v144_v17 = vadd.f32 %v378_v13, %v143_v16  ;;  %v163_v21 = vmax.f32 %v149_v15, 0.0 }
  0xe6   :  { %v435_v18 = vpop.f32.mrf.mxu0 }
  0xe7   :  { %v162_v19 = vmax.f32 %v144_v17, 0.0  ;;  %v159_v20 = vadd.f32 %v435_v18, %v378_v13 }
  0xe8   :  { %v153_v22 = vpop.f32.mrf.mxu0 }
  0xe9   :  { %v154_v23 = vadd.f32 %v378_v13, %v153_v22  ;;  %438 = vmatprep.mubr.msk.f32.mxu1 %vm174_vm1, %v162_v19  ;;  %v165_v24 = vmax.f32 %v159_v20, 0.0 }
  0xea   :  { %439 = vmatmul.mubr.msk.f32.vlgmr.msra.gmra.mxu1 %vm174_vm1, %v163_v21 }
  0xeb   :  { %v164_v25 = vmax.f32 %v154_v23, 0.0 }
  0xed   :  { %441 = vmatprep.mubr.msk.f32.mxu1 %vm174_vm1, %v164_v25 }
  0xee   :  { %442 = vmatmul.mubr.msk.f32.gmra.mxu1 %vm174_vm1, %v165_v24 }
 0x1aa   :  { %v440_v27 = vpop.f32.mrf.mxu1 }
 0x1ab   :  { %v262_v28 = vadd.f32 %v440_v27, %v391_v26 }
 0x1ac   :  { %v256_v29 = vpop.f32.mrf.mxu1 }
 0x1ad   :  { %v257_v30 = vadd.f32 %v391_v26, %v256_v29  ;;  %v277_v32 = vsel %vm275_vm2, %v262_v28, -inf }
 0x1ae   :  { %v443_v31 = vpop.f32.mrf.mxu1 }
 0x1af   :  { %v276_v33 = vsel %vm275_vm2, %v257_v30, -inf  ;;  %v272_v34 = vadd.f32 %v443_v31, %v391_v26 }
 0x1b0   :  { %v278_v35 = vmax.f32 %v276_v33, %v277_v32  ;;  %v266_v36 = vpop.f32.mrf.mxu1 }
 0x1b1   :  { %v286_v37 = vsel %vm275_vm2, %v272_v34, -inf  ;;  %v267_v38 = vadd.f32 %v391_v26, %v266_v36 }
 0x1b2   :  { %v279_v39 = vrot.slane %v278_v35, 4 }
 0x1b3   :  { %v285_v40 = vsel %vm275_vm2, %v267_v38, -inf }
 0x1b4   :  { %v280_v41 = vmax.f32 %v278_v35, %v279_v39  ;;  %v287_v42 = vmax.f32 %v285_v40, %v286_v37 }
 0x1b6   :  { %v281_v43 = vrot.slane %v280_v41, 2  ;;  %v288_v44 = vrot.slane %v287_v42, 4 }
 0x1b8   :  { %v282_v45 = vmax.f32 %v280_v41, %v281_v43  ;;  %v289_v46 = vmax.f32 %v287_v42, %v288_v44 }
 0x1ba   :  { %v283_v47 = vrot.slane %v282_v45, 1  ;;  %v290_v48 = vrot.slane %v289_v46, 2 }
 0x1bc   :  { %v284_v49 = vmax.f32 %v282_v45, %v283_v47  ;;  %v291_v50 = vmax.f32 %v289_v46, %v290_v48 }
 0x1be   :  { %v294_v51 = vsub.f32 %v257_v30, %v284_v49  ;;  %v295_v52 = vsub.f32 %v262_v28, %v284_v49  ;;  %v292_v53 = vrot.slane %v291_v50, 1 }
 0x1c0   :  { %v298_v54 = vmul.f32 1.442695, %v294_v51  ;;  %v300_v55 = vmul.f32 1.442695, %v295_v52  ;;  %v293_v56 = vmax.f32 %v291_v50, %v292_v53 }
 0x1c2   :  { %446 = vpow2.f32 %v298_v54  ;;  %v296_v57 = vsub.f32 %v267_v38, %v293_v56  ;;  %v297_v58 = vsub.f32 %v272_v34, %v293_v56 }
 0x1c3   :  { %448 = vpow2.f32 %v300_v55 }
 0x1c4   :  { %v302_v59 = vmul.f32 1.442695, %v296_v57  ;;  %v304_v60 = vmul.f32 1.442695, %v297_v58 }
 0x1c6   :  { %450 = vpow2.f32 %v302_v59 }
 0x1c7   :  { %452 = vpow2.f32 %v304_v60 }
 0x1cf   :  { %v447_v61 = vpop.eup %446 }
 0x1d0   :  { %v449_v62 = vpop.eup %448  ;;  %v306_v63 = vsel %vm275_vm2, %v447_v61, 0.0 }
 0x1d1   :  { %v307_v0 = vsel %vm275_vm2, %v449_v62, 0.0 }
 0x1d2   :  { %v308_v1 = vadd.f32 %v307_v0, %v306_v63 }
 0x1d3   :  { %v451_v2 = vpop.eup %450 }
 0x1d4   :  { %v453_v3 = vpop.eup %452  ;;  %v315_v4 = vsel %vm275_vm2, %v451_v2, 0.0  ;;  %v309_v5 = vrot.slane %v308_v1, 4 }
 0x1d5   :  { %v316_v6 = vsel %vm275_vm2, %v453_v3, 0.0 }
 0x1d6   :  { %v317_v7 = vadd.f32 %v316_v6, %v315_v4  ;;  %v310_v8 = vadd.f32 %v309_v5, %v308_v1 }
 0x1d8   :  { %v318_v9 = vrot.slane %v317_v7, 4  ;;  %v311_v10 = vrot.slane %v310_v8, 2 }
 0x1da   :  { %v312_v11 = vadd.f32 %v311_v10, %v310_v8  ;;  %v319_v12 = vadd.f32 %v318_v9, %v317_v7 }
 0x1dc   :  { %v313_v13 = vrot.slane %v312_v11, 1  ;;  %v320_v14 = vrot.slane %v319_v12, 2 }
 0x1de   :  { %v314_v15 = vadd.f32 %v313_v13, %v312_v11  ;;  %v321_v16 = vadd.f32 %v320_v14, %v319_v12 }
 0x1e0   :  { %454 = vrcp.f32 %v314_v15  ;;  %v322_v17 = vrot.slane %v321_v16, 1 }
 0x1e2   :  { %v323_v18 = vadd.f32 %v322_v17, %v321_v16 }
 0x1e4   :  { %456 = vrcp.f32 %v323_v18 }
 0x1ed   :  { %v455_v19 = vpop.eup %454 }
 0x1ee   :  { %v326_v20 = vmul.f32 %v455_v19, %v447_v61  ;;  %v327_v21 = vmul.f32 %v455_v19, %v449_v62 }
 0x1f0   :  { %330 = vxpose.xlu0.b32.start [1/4] (short) (narrow) %v326_v20, 8 }
 0x1f1   :  { %v457_v22 = vpop.eup %456 }
 0x1f2   :  { %v328_v23 = vmul.f32 %v457_v22, %v451_v2  ;;  %v329_v24 = vmul.f32 %v457_v22, %v453_v3 }
 0x1f4   :  { %331 = vxpose.xlu0.b32.cont [2/4] (short) (narrow) %v327_v21, 8 }
 0x1f8   :  { %332 = vxpose.xlu0.b32.cont [3/4] (short) (narrow) %v328_v23, 8 }
 0x1fc   :  { %333 = vxpose.xlu0.b32.end [4/4] (short) (narrow) %v329_v24, 8 }
 0x26c   :  { %v346_v25 = vpop.trf.xlu0 }
 0x26d   :  { %363 = vst.msk [vmem:[#allocation2] sm:$0xf] %vm362_vm3, %v346_v25 }
 0x26e   :  { %469 = shalt.err (!%p466_p4)
}
 0x26f   :  { %373 = dma.vmem_to_hbm [thread:$0]  %s371_s4, 64, %s598_s5, [#allocation3]  }
 0x270   :  { %478 = dma.done.wait [#allocation3], 64  }
 0x271   :  { %479 = vsyncadd [#allocation3], 4294967232 }
 0x272   :  { %377 = vsyncpa [#allocation3], 1 }

</bundles_post_ra>
